<compile_context>
chip_gen: v6e
topology: v6e:2x2x1
jax: 0.10.0
libtpu: 0.0.40
codegen_flags: <defaults>
</compile_context>

<pallas_src>
import functools

import jax
import jax.numpy as jnp
from jax.experimental import pallas as pl
from jax.experimental.pallas import tpu as pltpu

EPS = 1e-5


def _round_up(a, b):
    return (a + b - 1) // b * b


def ln_mm_kernel(x_ref, w_ref, b_ref, gamma_ref, beta_ref, o_ref, y_ref):
    # x_ref: (TM, N) row tile, w_ref: (N, TN) weight tile, b_ref: (1, TN),
    # gamma_ref/beta_ref: (1, N), o_ref: (TM, TN),
    # y_ref: (TM, N) VMEM scratch holding LayerNorm(x) in the matmul operand dtype.
    j = pl.program_id(1)

    # LayerNorm once per row tile (D axis is innermost); reuse across all D tiles.
    @pl.when(j == 0)
    def _():
        x = x_ref[...].astype(jnp.float32)
        mean = jnp.mean(x, axis=-1, keepdims=True)
        centered = x - mean
        var = jnp.mean(centered * centered, axis=-1, keepdims=True)
        rstd = jax.lax.rsqrt(var + EPS)          # EUP rsqrt (free slot)
        y = centered * rstd * gamma_ref[...].astype(jnp.float32) \
            + beta_ref[...].astype(jnp.float32)
        y_ref[...] = y.astype(y_ref.dtype)

    # MXU matmul in the weight's native dtype, f32 accumulation.
    out = jnp.dot(y_ref[...], w_ref[...], preferred_element_type=jnp.float32)
    out = out + b_ref[...].astype(jnp.float32)
    o_ref[...] = out.astype(o_ref.dtype)


def _select_tiles(M_total, N, D_pad, x_bytes, w_bytes, out_bytes, c_bytes, tm, tn):
    """Pick (TM, TN) that keeps the VMEM working set within budget."""
    row_align = 16 if x_bytes == 2 else 8
    TM = min(tm, _round_up(M_total, row_align))
    TM = max(row_align, _round_up(TM, row_align))

    tn_cands = [c for c in dict.fromkeys((tn, 512, 256, 128))
                if c <= D_pad and D_pad % c == 0]
    if not tn_cands:
        tn_cands = [D_pad]
    ti = 0
    TN = tn_cands[ti]

    BUDGET = 28 * 1024 * 1024  # comfortably under v7x's 64 MiB physical VMEM

    def est(tm_, tn_):
        return (2 * tm_ * N * x_bytes          # x tile (double-buffered)
                + 2 * N * tn_ * w_bytes        # weight tile (double-buffered)
                + 2 * tm_ * tn_ * out_bytes    # output tile (double-buffered)
                + 2 * (2 * N * 4 + tn_ * 4)    # gamma/beta/bias (f32 upper bound)
                + tm_ * N * c_bytes)           # LN scratch (single buffer)

    # Shrink TN first (keeps MXU rows fed), then TM.
    while est(TM, TN) > BUDGET:
        if ti + 1 < len(tn_cands):
            ti += 1
            TN = tn_cands[ti]
        elif TM > row_align:
            TM = max(row_align, _round_up(TM // 2, row_align))
        else:
            break
    return TM, TN


@functools.partial(jax.jit, static_argnames=("tm", "tn"))
def ln_matmul(x, w, b, gamma, beta, tm=256, tn=512):
    """Fused LayerNorm + matmul + bias (forward of lnMatmulBlock)."""
    orig_shape = x.shape
    N = orig_shape[-1]
    D = w.shape[1]

    x2 = x.reshape(-1, N)                       # (M_total, N)
    M_total = x2.shape[0]

    compute_dtype = w.dtype                     # matmul operand dtype (e.g. bf16)
    D_pad = _round_up(D, 128)                   # lane-dense output columns

    TM, TN = _select_tiles(
        M_total, N, D_pad,
        x_bytes=x.dtype.itemsize, w_bytes=w.dtype.itemsize,
        out_bytes=x.dtype.itemsize, c_bytes=jnp.dtype(compute_dtype).itemsize,
        tm=tm, tn=tn)
    M_pad = _round_up(M_total, TM)

    # --- padding --------------------------------------------------------------
    if M_pad != M_total:
        x2 = jnp.pad(x2, ((0, M_pad - M_total), (0, 0)))
    w2 = w
    b2 = b.reshape(1, D)
    if D_pad != D:
        w2 = jnp.pad(w, ((0, 0), (0, D_pad - D)))
        b2 = jnp.pad(b2, ((0, 0), (0, D_pad - D)))
    gamma2 = gamma.reshape(1, N)
    beta2 = beta.reshape(1, N)

    grid = (M_pad // TM, D_pad // TN)

    out2 = pl.pallas_call(
        ln_mm_kernel,
        out_shape=jax.ShapeDtypeStruct((M_pad, D_pad), x.dtype),
        grid_spec=pltpu.PrefetchScalarGridSpec(
            num_scalar_prefetch=0,
            grid=grid,
            in_specs=[
                pl.BlockSpec((TM, N), lambda i, j: (i, 0)),   # x row tile
                pl.BlockSpec((N, TN), lambda i, j: (0, j)),   # weight D tile
                pl.BlockSpec((1, TN), lambda i, j: (0, j)),   # bias D tile
                pl.BlockSpec((1, N), lambda i, j: (0, 0)),    # gamma
                pl.BlockSpec((1, N), lambda i, j: (0, 0)),    # beta
            ],
            out_specs=pl.BlockSpec((TM, TN), lambda i, j: (i, j)),
            scratch_shapes=[pltpu.VMEM((TM, N), compute_dtype)],  # LN(x) tile
        ),
        compiler_params=pltpu.CompilerParams(
            # i: independent row tiles (megacore-shardable);
            # j: carries the LN scratch across D tiles -> arbitrary.
            dimension_semantics=("parallel", "arbitrary"),
            vmem_limit_bytes=48 * 1024 * 1024,
        ),
    )(x2, w2, b2, gamma2, beta2)

    out2 = out2[:M_total, :D]
    return out2.reshape(*orig_shape[:-1], D)


def ln_matmul_ref(x, w, b, gamma, beta):
    x32 = x.astype(jnp.float32)
    mean = jnp.mean(x32, axis=-1, keepdims=True)
    var = jnp.mean((x32 - mean) ** 2, axis=-1, keepdims=True)
    xhat = (x32 - mean) * jax.lax.rsqrt(var + EPS)
    y = xhat * gamma.astype(jnp.float32) + beta.astype(jnp.float32)
    out = y @ w.astype(jnp.float32) + b.astype(jnp.float32)
    return out.astype(x.dtype)


if __name__ == "__main__":
    # TODO(synk): only the forward pass of lnMatmulFunc is implemented; the custom
    # autograd backward (torch.ops.my_ops.ln_mm_backward) is out of scope here.
    key = jax.random.PRNGKey(0)

    # Case 1: small, lane-aligned shapes (in_dim=N=128, out_dim=D=256), f32.
    B, M, N, D = 2, 8, 128, 256
    kx, kw, k3 = jax.random.split(key, 3)
    x = jax.random.normal(kx, (B, M, N), dtype=jnp.float32)
    # Parameter init mirroring the PyTorch __init__:
    #   w ~ Normal(0, 0.02), b = 0, gamma = 1, beta = 0
    w = 0.02 * jax.random.normal(kw, (N, D), dtype=jnp.float32)
    b = jnp.zeros((D,), dtype=jnp.float32)
    gamma = jnp.ones((N,), dtype=jnp.float32)
    beta = jnp.zeros((N,), dtype=jnp.float32)

    out = ln_matmul(x, w, b, gamma, beta)
    jax.block_until_ready(out)
    ref = ln_matmul_ref(x, w, b, gamma, beta)
    assert out.shape == (B, M, D)
    assert jnp.allclose(out, ref, atol=1e-4, rtol=1e-4)

    # Case 2: unaligned rows / D (exercises padding + output slicing), f32.
    B2, M2, N2, D2 = 2, 10, 64, 96
    kx2, kw2 = jax.random.split(kw)
    x2 = jax.random.normal(kx2, (B2, M2, N2), dtype=jnp.float32)
    w2 = 0.02 * jax.random.normal(kw2, (N2, D2), dtype=jnp.float32)
    b2 = jnp.zeros((D2,), dtype=jnp.float32)
    gamma2 = jnp.ones((N2,), dtype=jnp.float32)
    beta2 = jnp.zeros((N2,), dtype=jnp.float32)

    out2 = ln_matmul(x2, w2, b2, gamma2, beta2)
    jax.block_until_ready(out2)
    ref2 = ln_matmul_ref(x2, w2, b2, gamma2, beta2)
    assert out2.shape == (B2, M2, D2)
    assert jnp.allclose(out2, ref2, atol=1e-4, rtol=1e-4)

    # Case 3: bf16 activations/weights, multiple D tiles (exercises the LN-scratch
    # reuse across the inner D axis and the bf16 MXU path).
    B3, M3, N3, D3 = 2, 16, 256, 384
    kx3, kw3 = jax.random.split(k3)
    x3 = jax.random.normal(kx3, (B3, M3, N3), dtype=jnp.float32).astype(jnp.bfloat16)
    w3 = (0.02 * jax.random.normal(kw3, (N3, D3), dtype=jnp.float32)).astype(jnp.bfloat16)
    b3 = jnp.zeros((D3,), dtype=jnp.bfloat16)
    gamma3 = jnp.ones((N3,), dtype=jnp.bfloat16)
    beta3 = jnp.zeros((N3,), dtype=jnp.bfloat16)

    out3 = ln_matmul(x3, w3, b3, gamma3, beta3, tn=128)
    jax.block_until_ready(out3)
    ref3 = ln_matmul_ref(x3, w3, b3, gamma3, beta3)
    assert out3.shape == (B3, M3, D3)
    assert jnp.allclose(out3.astype(jnp.float32), ref3.astype(jnp.float32),
                        atol=3e-2, rtol=3e-2)

    print("KERNEL_OK")
</pallas_src>

<mosaic_0001>
module attributes {stable_mosaic.version = 11 : i64} {
  func.func @ln_mm_kernel(%arg0: i32, %arg1: i32, %arg2: memref<16x128xf32, #tpu.memory_space<vmem>>, %arg3: memref<128x256xf32, #tpu.memory_space<vmem>>, %arg4: memref<1x256xf32, #tpu.memory_space<vmem>>, %arg5: memref<1x128xf32, #tpu.memory_space<vmem>>, %arg6: memref<1x128xf32, #tpu.memory_space<vmem>>, %arg7: memref<16x256xf32, #tpu.memory_space<vmem>>, %arg8: memref<16x128xf32, #tpu.memory_space<vmem>>) attributes {dimension_semantics = [#tpu.dimension_semantics<parallel>, #tpu.dimension_semantics<arbitrary>], iteration_bounds = array<i64: 1, 1>, scalar_prefetch = 0 : i64, scratch_operands = 1 : i64, tpu.core_type = #tpu.core_type<tc>, window_params = [{transform_indices = @transform_0, window_bounds = array<i64: 16, 128>}, {transform_indices = @transform_1, window_bounds = array<i64: 128, 256>}, {transform_indices = @transform_2, window_bounds = array<i64: 1, 256>}, {pipeline_mode = #tpu.pipeline_mode<synchronous>, transform_indices = @transform_3, window_bounds = array<i64: 1, 128>}, {pipeline_mode = #tpu.pipeline_mode<synchronous>, transform_indices = @transform_4, window_bounds = array<i64: 1, 128>}, {transform_indices = @transform_5, window_bounds = array<i64: 16, 256>}]} {
    %c0_i32 = arith.constant 0 : i32
    %0 = arith.cmpi eq, %arg1, %c0_i32 : i32
    %1 = arith.extui %0 : i1 to i32
    %c0_i32_0 = arith.constant 0 : i32
    %2 = arith.cmpi ne, %1, %c0_i32_0 : i32
    scf.if %2 {
      %c0_8 = arith.constant 0 : index
      %c0_9 = arith.constant 0 : index
      %10 = vector.load %arg2[%c0_8, %c0_9] : memref<16x128xf32, #tpu.memory_space<vmem>>, vector<16x128xf32>
      %cst_10 = arith.constant dense<0.000000e+00> : vector<16xf32>
      %11 = vector.multi_reduction <add>, %10, %cst_10 [1] : vector<16x128xf32> to vector<16xf32>
      %12 = vector.shape_cast %11 : vector<16xf32> to vector<16x1xf32>
      %cst_11 = arith.constant 1.280000e+02 : f32
      %13 = vector.broadcast %cst_11 : f32 to vector<16x1xf32>
      %14 = arith.divf %12, %13 : vector<16x1xf32>
      %15 = vector.broadcast %14 : vector<16x1xf32> to vector<16x128xf32>
      %16 = arith.subf %10, %15 : vector<16x128xf32>
      %17 = arith.mulf %16, %16 : vector<16x128xf32>
      %cst_12 = arith.constant dense<0.000000e+00> : vector<16xf32>
      %18 = vector.multi_reduction <add>, %17, %cst_12 [1] : vector<16x128xf32> to vector<16xf32>
      %19 = vector.shape_cast %18 : vector<16xf32> to vector<16x1xf32>
      %cst_13 = arith.constant 1.280000e+02 : f32
      %20 = vector.broadcast %cst_13 : f32 to vector<16x1xf32>
      %21 = arith.divf %19, %20 : vector<16x1xf32>
      %cst_14 = arith.constant 9.99999974E-6 : f32
      %22 = vector.broadcast %cst_14 : f32 to vector<16x1xf32>
      %23 = arith.addf %21, %22 : vector<16x1xf32>
      %24 = math.rsqrt %23 : vector<16x1xf32>
      %25 = vector.broadcast %24 : vector<16x1xf32> to vector<16x128xf32>
      %26 = arith.mulf %16, %25 : vector<16x128xf32>
      %c0_15 = arith.constant 0 : index
      %c0_16 = arith.constant 0 : index
      %27 = vector.load %arg5[%c0_15, %c0_16] : memref<1x128xf32, #tpu.memory_space<vmem>>, vector<1x128xf32>
      %28 = vector.broadcast %27 : vector<1x128xf32> to vector<16x128xf32>
      %29 = arith.mulf %26, %28 : vector<16x128xf32>
      %c0_17 = arith.constant 0 : index
      %c0_18 = arith.constant 0 : index
      %30 = vector.load %arg6[%c0_17, %c0_18] : memref<1x128xf32, #tpu.memory_space<vmem>>, vector<1x128xf32>
      %31 = vector.broadcast %30 : vector<1x128xf32> to vector<16x128xf32>
      %32 = arith.addf %29, %31 : vector<16x128xf32>
      %c0_19 = arith.constant 0 : index
      %c0_20 = arith.constant 0 : index
      %33 = vector.load %arg8[%c0_19, %c0_20] : memref<16x128xf32, #tpu.memory_space<vmem>>, vector<16x128xf32>
      tpu.vector_store %arg8[%c0_19, %c0_20], %32 {strides = array<i32>} : memref<16x128xf32, #tpu.memory_space<vmem>>, vector<16x128xf32>,
    } else {
    }
    %c0 = arith.constant 0 : index
    %c0_1 = arith.constant 0 : index
    %3 = vector.load %arg8[%c0, %c0_1] : memref<16x128xf32, #tpu.memory_space<vmem>>, vector<16x128xf32>
    %c0_2 = arith.constant 0 : index
    %c0_3 = arith.constant 0 : index
    %4 = vector.load %arg3[%c0_2, %c0_3] : memref<128x256xf32, #tpu.memory_space<vmem>>, vector<128x256xf32>
    %cst = arith.constant dense<0.000000e+00> : vector<16x256xf32>
    %5 = tpu.matmul %3, %4, %cst {dimension_numbers = #tpu.dot_dimension_numbers<[1], [0], [0], [1], [0, 0, 1, 1], [], []>} : vector<16x128xf32>, vector<128x256xf32>, vector<16x256xf32> -> vector<16x256xf32>
    %c0_4 = arith.constant 0 : index
    %c0_5 = arith.constant 0 : index
    %6 = vector.load %arg4[%c0_4, %c0_5] : memref<1x256xf32, #tpu.memory_space<vmem>>, vector<1x256xf32>
    %7 = vector.broadcast %6 : vector<1x256xf32> to vector<16x256xf32>
    %8 = arith.addf %5, %7 : vector<16x256xf32>
    %c0_6 = arith.constant 0 : index
    %c0_7 = arith.constant 0 : index
    %9 = vector.load %arg7[%c0_6, %c0_7] : memref<16x256xf32, #tpu.memory_space<vmem>>, vector<16x256xf32>
    tpu.vector_store %arg7[%c0_6, %c0_7], %8 {strides = array<i32>} : memref<16x256xf32, #tpu.memory_space<vmem>>, vector<16x256xf32>,
    return
  }
  func.func @transform_0(%arg0: i32, %arg1: i32) -> (i32, i32) {
    %c0_i32 = arith.constant 0 : i32
    %c0_i32_0 = arith.constant 0 : i32
    return %arg0, %c0_i32 : i32, i32
  }
  func.func @transform_1(%arg0: i32, %arg1: i32) -> (i32, i32) {
    %c0_i32 = arith.constant 0 : i32
    %c0_i32_0 = arith.constant 0 : i32
    return %c0_i32, %arg1 : i32, i32
  }
  func.func @transform_2(%arg0: i32, %arg1: i32) -> (i32, i32) {
    %c0_i32 = arith.constant 0 : i32
    %c0_i32_0 = arith.constant 0 : i32
    return %c0_i32, %arg1 : i32, i32
  }
  func.func @transform_3(%arg0: i32, %arg1: i32) -> (i32, i32) {
    %c0_i32 = arith.constant 0 : i32
    %c0_i32_0 = arith.constant 0 : i32
    %c0_i32_1 = arith.constant 0 : i32
    return %c0_i32, %c0_i32_0 : i32, i32
  }
  func.func @transform_4(%arg0: i32, %arg1: i32) -> (i32, i32) {
    %c0_i32 = arith.constant 0 : i32
    %c0_i32_0 = arith.constant 0 : i32
    %c0_i32_1 = arith.constant 0 : i32
    return %c0_i32, %c0_i32_0 : i32, i32
  }
  func.func @transform_5(%arg0: i32, %arg1: i32) -> (i32, i32) {
    %c0_i32 = arith.constant 0 : i32
    return %arg0, %arg1 : i32, i32
  }
}

</mosaic_0001>

<bundles_post_ra>
// kernel: ln_matmul.1
= control target key start
LH: loop header
LB: loop body
LE: loop exit
PB: predicated region body
PF: predicated region fallthrough
CT: control target
= control target key end

     0   :  { %10 = vsyncpa [#allocation4], 0  ;;  %s427_s0 = inlined_call_operand.hbm [shape: f32[16,128], index: 0, kind: input, shape index: {}]   ;;  %s428_s1 = inlined_call_operand.hbm [shape: f32[128,256], index: 1, kind: input, shape index: {}]   ;;  %s429_s2 = inlined_call_operand.vmem [shape: f32[1,256], index: 2, kind: input, shape index: {}]   ;;  %s430_s3 = inlined_call_operand.vmem [shape: f32[1,128], index: 3, kind: input, shape index: {}]   ;;  %s431_s4 = inlined_call_operand.vmem [shape: f32[1,128], index: 4, kind: input, shape index: {}]   ;;  %s432_s5 = inlined_call_operand.hbm [shape: f32[16,256], index: 5, kind: output, shape index: {}]  }
   0x1   :  { %11 = vsyncpa [#allocation7], 0 }
   0x2   :  { %12 = vsyncpa [#allocation5], 0  ;;  %s355_s18 = smov [#allocation3]  }
   0x3   :  { %s18_s19 = sshll.u32 %s355_s18, 4  ;;  %s19_s19 = int_to_ptr.vmem [resolvable:$true] %s18_s19 }
   0x4   :  { %s297_s20 = scalar_lea.vmem %s19_s19, 256  ;;  %p302_p1 = scmp.lt.s32.totalorder %s19_s19, %s19_s19 }
   0x5   :  { %p298_p0 = scmp.ne.s32.totalorder %s19_s19, %s297_s20  ;;  %p303_p2 = scmp.lt.s32.totalorder %s297_s20, %s297_s20 }
   0x7   :  { %p304_p3 = por %p303_p2, %p302_p1 }
   0x9   :  { %p305_p4 = pnand %p304_p3, %p298_p0 }
   0xb   :  { %308 = shalt.err (!%p305_p4)
}
   0xc   :  { %s356_s21 = smov 128   ;;  %s357_s22 = smov 8  }
   0xd   :  { %24 = dma.hbm_to_vmem [thread:$0]  %s427_s0, 256, %s19_s19, [#allocation4], %s356_s21, %s356_s21, %s357_s22  }
   0xe   :  { %s358_s25 = smov [#allocation6]  }
   0xf   :  { %s30_s26 = sshll.u32 %s358_s25, 4  ;;  %s31_s26 = int_to_ptr.vmem [resolvable:$true] %s30_s26 }
  0x10   :  { %s317_s27 = scalar_lea.vmem %s31_s26, 4096  ;;  %p322_p6 = scmp.lt.s32.totalorder %s31_s26, %s31_s26 }
  0x11   :  { %p318_p5 = scmp.ne.s32.totalorder %s31_s26, %s317_s27  ;;  %p323_p7 = scmp.lt.s32.totalorder %s317_s27, %s317_s27 }
  0x13   :  { %p324_p8 = por %p323_p7, %p322_p6 }
  0x15   :  { %p325_p9 = pnand %p324_p8, %p318_p5 }
  0x17   :  { %328 = shalt.err (!%p325_p9)
}
  0x18   :  { %s359_s28 = smov 256   ;;  %s360_s29 = smov 16  }
  0x19   :  { %36 = dma.hbm_to_vmem [thread:$0]  %s428_s1, 4096, %s31_s26, [#allocation7], %s359_s28, %s359_s28, %s360_s29  }
  0x1a   :  { %349 = dma.done.wait [#allocation4], 256  }
  0x1b   :  { %350 = vsyncadd [#allocation4], 4294967040 }
  0x1c   :  { %351 = dma.done.wait [#allocation7], 4096  }
  0x1d   :  { %352 = vsyncadd [#allocation7], 4294963200  ;;  %v53_v0 = vld [vmem:[#allocation3] sm:$0xff]  ;;  %v54_v1 = vld [vmem:[#allocation3 + $0x8] sm:$0xff]  ;;  %v361_v42 = vmov 0.0   ;;  %v134_v59 = vlaneseq }
  0x1e   :  { %55 = vadd.xlane.f32.xlu0 %v53_v0  ;;  %v131_v2 = vld [vmem:[#allocation6 + $0xf8] sm:$0xff]  ;;  %v130_v3 = vld [vmem:[#allocation6 + $0xf0] sm:$0xff]  ;;  %v129_v4 = vld [vmem:[#allocation6 + $0xe8] sm:$0xff]  ;;  %208 = vmatprep.mubr.f32.mxu0 %v361_v42 }
  0x1f   :  { %144 = vmatprep.subr.mxu0 %v131_v2  ;;  %v128_v5 = vld [vmem:[#allocation6 + $0xe0] sm:$0xff]  ;;  %245 = vmatprep.subr.mxu1 %v131_v2  ;;  %v127_v6 = vld [vmem:[#allocation6 + $0xd8] sm:$0xff]  ;;  %v126_v7 = vld [vmem:[#allocation6 + $0xd0] sm:$0xff]  ;;  %v135_v60 = vshrl.u32 %v134_v59, 7 }
  0x20   :  { %145 = vmatpush1.msra.mxu0 %v130_v3  ;;  %261 = vmatpush1.msra.mxu1 %v130_v3  ;;  %v125_v8 = vld [vmem:[#allocation6 + $0xc8] sm:$0xff]  ;;  %v124_v9 = vld [vmem:[#allocation6 + $0xc0] sm:$0xff]  ;;  %v123_v18 = vld [vmem:[#allocation6 + $0xb8] sm:$0xff] }
  0x21   :  { %146 = vmatprep.subr.mxu0 %v129_v4  ;;  %246 = vmatprep.subr.mxu1 %v129_v4  ;;  %v122_v19 = vld [vmem:[#allocation6 + $0xb0] sm:$0xff]  ;;  %v121_v20 = vld [vmem:[#allocation6 + $0xa8] sm:$0xff]  ;;  %v120_v21 = vld [vmem:[#allocation6 + $0xa0] sm:$0xff]  ;;  %v136_v61 = vsub.s32 0, %v135_v60  ;;  %v140_v63 = vsub.s32 1, %v135_v60 }
  0x22   :  { %57 = vadd.xlane.f32.xlu0 %v54_v1  ;;  %147 = vmatpush1.msra.mxu0 %v128_v5  ;;  %v119_v22 = vld [vmem:[#allocation6 + $0x98] sm:$0xff]  ;;  %v118_v23 = vld [vmem:[#allocation6 + $0x90] sm:$0xff]  ;;  %v117_v24 = vld [vmem:[#allocation6 + $0x88] sm:$0xff] }
  0x23   :  { %262 = vmatpush1.msra.mxu1 %v128_v5  ;;  %148 = vmatprep.subr.mxu0 %v127_v6  ;;  %v116_v25 = vld [vmem:[#allocation6 + $0x80] sm:$0xff]  ;;  %v115_v26 = vld [vmem:[#allocation6 + $0x78] sm:$0xff]  ;;  %v114_v27 = vld [vmem:[#allocation6 + $0x70] sm:$0xff] }
  0x24   :  { %247 = vmatprep.subr.mxu1 %v127_v6  ;;  %149 = vmatpush1.msra.mxu0 %v126_v7  ;;  %v113_v28 = vld [vmem:[#allocation6 + $0x68] sm:$0xff]  ;;  %v112_v29 = vld [vmem:[#allocation6 + $0x60] sm:$0xff]  ;;  %v111_v30 = vld [vmem:[#allocation6 + $0x58] sm:$0xff] }
  0x25   :  { %263 = vmatpush1.msra.mxu1 %v126_v7  ;;  %150 = vmatprep.subr.mxu0 %v125_v8  ;;  %v110_v31 = vld [vmem:[#allocation6 + $0x50] sm:$0xff]  ;;  %v109_v32 = vld [vmem:[#allocation6 + $0x48] sm:$0xff]  ;;  %v108_v33 = vld [vmem:[#allocation6 + $0x40] sm:$0xff] }
  0x26   :  { %248 = vmatprep.subr.mxu1 %v125_v8  ;;  %151 = vmatpush1.msra.mxu0 %v124_v9  ;;  %v107_v34 = vld [vmem:[#allocation6 + $0x38] sm:$0xff]  ;;  %v106_v35 = vld [vmem:[#allocation6 + $0x30] sm:$0xff]  ;;  %v105_v36 = vld [vmem:[#allocation6 + $0x28] sm:$0xff] }
  0x27   :  { %264 = vmatpush1.msra.mxu1 %v124_v9  ;;  %152 = vmatprep.subr.mxu0 %v123_v18  ;;  %v104_v37 = vld [vmem:[#allocation6 + $0x20] sm:$0xff]  ;;  %v103_v38 = vld [vmem:[#allocation6 + $0x18] sm:$0xff]  ;;  %v102_v39 = vld [vmem:[#allocation6 + $0x10] sm:$0xff] }
  0x28   :  { %249 = vmatprep.subr.mxu1 %v123_v18  ;;  %153 = vmatpush1.msra.mxu0 %v122_v19  ;;  %v101_v40 = vld [vmem:[#allocation6 + $0x8] sm:$0xff]  ;;  %v100_v41 = vld [vmem:[#allocation6] sm:$0xff]  ;;  %v243_v50 = vld [vmem:[%s430_s3] ss:$0 sm:$0xff] }
  0x29   :  { %265 = vmatpush1.msra.mxu1 %v122_v19  ;;  %154 = vmatprep.subr.mxu0 %v121_v20  ;;  %v244_v52 = vld [vmem:[%s431_s4] ss:$0 sm:$0xff]  ;;  %s362_s4 = smov [#allocation8]  }
  0x2a   :  { %250 = vmatprep.subr.mxu1 %v121_v20  ;;  %155 = vmatpush1.msra.mxu0 %v120_v21  ;;  %v132_v62 = vld [vmem:[%s429_s2] sm:$0x3]  ;;  %s230_s10 = sshll.u32 %s362_s4, 4  ;;  %s231_s10 = int_to_ptr.vmem [resolvable:$true] %s230_s10 }
  0x2b   :  { %266 = vmatpush1.msra.mxu1 %v120_v21  ;;  %156 = vmatprep.subr.mxu0 %v119_v22  ;;  %s329_s11 = scalar_lea.vmem %s231_s10, 512  ;;  %p334_p11 = scmp.lt.s32.totalorder %s231_s10, %s231_s10 }
  0x2c   :  { %251 = vmatprep.subr.mxu1 %v119_v22  ;;  %157 = vmatpush1.msra.mxu0 %v118_v23  ;;  %p330_p10 = scmp.ne.s32.totalorder %s231_s10, %s329_s11  ;;  %p335_p12 = scmp.lt.s32.totalorder %s329_s11, %s329_s11 }
  0x2d   :  { %267 = vmatpush1.msra.mxu1 %v118_v23  ;;  %158 = vmatprep.subr.mxu0 %v117_v24 }
  0x2e   :  { %252 = vmatprep.subr.mxu1 %v117_v24  ;;  %159 = vmatpush1.msra.mxu0 %v116_v25  ;;  %p336_p13 = por %p335_p12, %p334_p11 }
  0x2f   :  { %268 = vmatpush1.msra.mxu1 %v116_v25  ;;  %160 = vmatprep.subr.mxu0 %v115_v26 }
  0x30   :  { %253 = vmatprep.subr.mxu1 %v115_v26  ;;  %161 = vmatpush1.msra.mxu0 %v114_v27  ;;  %p337_p0 = pnand %p336_p13, %p330_p10 }
  0x31   :  { %269 = vmatpush1.msra.mxu1 %v114_v27  ;;  %162 = vmatprep.subr.mxu0 %v113_v28 }
  0x32   :  { %254 = vmatprep.subr.mxu1 %v113_v28  ;;  %163 = vmatpush1.msra.mxu0 %v112_v29 }
  0x33   :  { %270 = vmatpush1.msra.mxu1 %v112_v29  ;;  %164 = vmatprep.subr.mxu0 %v111_v30 }
  0x34   :  { %255 = vmatprep.subr.mxu1 %v111_v30  ;;  %165 = vmatpush1.msra.mxu0 %v110_v31 }
  0x35   :  { %271 = vmatpush1.msra.mxu1 %v110_v31  ;;  %166 = vmatprep.subr.mxu0 %v109_v32 }
  0x36   :  { %256 = vmatprep.subr.mxu1 %v109_v32  ;;  %167 = vmatpush1.msra.mxu0 %v108_v33 }
  0x37   :  { %272 = vmatpush1.msra.mxu1 %v108_v33  ;;  %168 = vmatprep.subr.mxu0 %v107_v34 }
  0x38   :  { %257 = vmatprep.subr.mxu1 %v107_v34  ;;  %169 = vmatpush1.msra.mxu0 %v106_v35 }
  0x39   :  { %273 = vmatpush1.msra.mxu1 %v106_v35  ;;  %170 = vmatprep.subr.mxu0 %v105_v36 }
  0x3a   :  { %258 = vmatprep.subr.mxu1 %v105_v36  ;;  %171 = vmatpush1.msra.mxu0 %v104_v37 }
  0x3b   :  { %274 = vmatpush1.msra.mxu1 %v104_v37  ;;  %172 = vmatprep.subr.mxu0 %v103_v38 }
  0x3c   :  { %173 = vmatpush1.msra.mxu0 %v102_v39  ;;  %259 = vmatprep.subr.mxu1 %v103_v38 }
  0x3d   :  { %174 = vmatprep.subr.mxu0 %v101_v40  ;;  %275 = vmatpush1.msra.mxu1 %v102_v39 }
  0x3e   :  { %175 = vmatpush1.msra.mxu0 %v100_v41  ;;  %260 = vmatprep.subr.mxu1 %v101_v40 }
  0x3f   :  { %276 = vmatpush1.msra.mxu1 %v100_v41  ;;  %214 = vmatprep.mubr.f32.mxu1 %v361_v42 }
  0xa7   :  { %v56_v10 = vpop.xlane.xlu0 %55 }
  0xa8   :  { %v60_v11 = vmul.f32 0.0078125, %v56_v10 }
  0xaa   :  { %v402_v12 = vsub.f32 %v53_v0, %v60_v11  ;;  %v137_v0 = vrot.slane %v132_v62, %v136_v61 }
  0xab   :  { %v58_v13 = vpop.xlane.xlu0 %57 }
  0xac   :  { %v61_v14 = vmul.f32 0.0078125, %v58_v13  ;;  %v64_v15 = vmul.f32 %v402_v12, %v402_v12 }
  0xae   :  { %v406_v16 = vsub.f32 %v54_v1, %v61_v14  ;;  %66 = vadd.xlane.f32.xlu1 %v64_v15  ;;  %v141_v1 = vrot.slane %v132_v62, %v140_v63 }
  0xb0   :  { %v65_v17 = vmul.f32 %v406_v16, %v406_v16 }
  0xb2   :  { %68 = vadd.xlane.f32.xlu1 %v65_v17 }
 0x137   :  { %v67_v43 = vpop.xlane.xlu1 %66 }
 0x138   :  { %v70_v44 = vmul.f32 0.0078125, %v67_v43 }
 0x13a   :  { %v72_v45 = vadd.f32 1e-05, %v70_v44 }
 0x13b   :  { %v69_v46 = vpop.xlane.xlu1 %68 }
 0x13c   :  { %285 = vrsqrt.f32 %v72_v45  ;;  %v71_v47 = vmul.f32 0.0078125, %v69_v46 }
 0x13e   :  { %v73_v48 = vadd.f32 1e-05, %v71_v47 }
 0x140   :  { %287 = vrsqrt.f32 %v73_v48 }
 0x149   :  { %v286_v49 = vpop.eup %285 }
 0x14a   :  { %v76_v51 = vmul.f32 %v286_v49, %v402_v12 }
 0x14c   :  { %v85_v53 = vmul.f32 %v243_v50, %v76_v51 }
 0x14d   :  { %v288_v54 = vpop.eup %287 }
 0x14e   :  { %v94_v55 = vadd.f32 %v244_v52, %v85_v53  ;;  %v77_v56 = vmul.f32 %v288_v54, %v406_v16 }
 0x150   :  { %209 = vmatmul.mubr.f32.vlgmr.msra.gmra.mxu0 %v94_v55  ;;  %v86_v57 = vmul.f32 %v243_v50, %v77_v56 }
 0x152   :  { %v95_v58 = vadd.f32 %v244_v52, %v86_v57 }
 0x154   :  { %215 = vmatmul.mubr.f32.vlgmr.msra.gmra.mxu1 %v95_v58 }
 0x210   :  { %v210_v2 = vpop.f32.mrf.mxu0 }
 0x211   :  { %v211_v3 = vadd.f32 %v210_v2, %v137_v0 }
 0x212   :  { %v212_v4 = vpop.f32.mrf.mxu0 }
 0x213   :  { %221 = vst [vmem:[#allocation8] sm:$0xff] %v211_v3  ;;  %v213_v5 = vadd.f32 %v212_v4, %v141_v1 }
 0x214   :  { %v216_v6 = vpop.f32.mrf.mxu1 }
 0x215   :  { %222 = vst [vmem:[#allocation8 + $0x8] sm:$0xff] %v213_v5  ;;  %v217_v7 = vadd.f32 %v216_v6, %v137_v0 }
 0x216   :  { %v218_v8 = vpop.f32.mrf.mxu1 }
 0x217   :  { %223 = vst [vmem:[#allocation8 + $0x10] sm:$0xff] %v217_v7  ;;  %v219_v9 = vadd.f32 %v218_v8, %v141_v1 }
 0x219   :  { %224 = vst [vmem:[#allocation8 + $0x18] sm:$0xff] %v219_v9 }
 0x21a   :  { %340 = shalt.err (!%p337_p0)
}
 0x21b   :  { %236 = dma.vmem_to_hbm [thread:$0]  %s231_s10, 512, %s432_s5, [#allocation5], %s359_s28, %s359_s28, %s360_s29  }
 0x21c   :  { %353 = dma.done.wait [#allocation5], 512  }
 0x21d   :  { %354 = vsyncadd [#allocation5], 4294966784 }
 0x21e   :  { %240 = vsyncpa [#allocation4], 1 }
 0x21f   :  { %241 = vsyncpa [#allocation7], 1 }
 0x220   :  { %242 = vsyncpa [#allocation5], 1 }

</bundles_post_ra>
